<compile_context>
chip_gen: v7x
topology: tpu7x:2x2x1
jax: 0.10.0
libtpu: 0.0.40
codegen_flags: <defaults>
</compile_context>

<pallas_src>
import functools

import jax
import jax.numpy as jnp
from jax.experimental import pallas as pl
from jax.experimental.pallas import tpu as pltpu

IN_DIM = 10
HID_DIM = 32
OUT_DIM = 2
LANE = 128  # TPU lane width


def _round_up(n, m):
    return ((n + m - 1) // m) * m


def _mlp_kernel(x_ref, w1_ref, b1_ref, w2_ref, b2_ref, o_ref):
    # x tile arrives in its natural (TB, 10) layout; cast to the compute dtype
    # in-kernel (no wrapper pre-pass).
    x = x_ref[...].astype(w1_ref.dtype)                               # (TB, 10)
    # h = W1 @ x^T : contract both size-10 axes -> (32, TB).  The transpose of
    # the (TB, 10) operand is done in VMEM on the XLU as part of lowering.
    h = jax.lax.dot_general(
        w1_ref[...], x,
        dimension_numbers=(((1,), (1,)), ((), ())),
        preferred_element_type=jnp.float32)                           # (32, TB) f32 acc
    h = jnp.maximum(h + b1_ref[...], 0.0)                             # bias + relu, f32
    y = jnp.dot(w2_ref[...], h.astype(w2_ref.dtype),
                preferred_element_type=jnp.float32)                   # (2, TB) f32 acc
    o_ref[...] = jax.nn.sigmoid(y + b2_ref[...])                      # lane-dense f32 store


@functools.partial(jax.jit, static_argnames=("block_b", "compute_dtype"))
def _net_forward_pallas(x, w1, b1, w2, b2, *, block_b, compute_dtype):
    """sigmoid(relu(x @ w1.T + b1) @ w2.T + b2) via a batch-tiled Pallas kernel."""
    B = x.shape[0]
    # Lane-aligned batch tile; ragged tail handled by the pipeline (no padding).
    tb = _round_up(min(block_b, _round_up(B, LANE)), LANE)
    grid = (pl.cdiv(B, tb),)

    w1c = w1.astype(compute_dtype)                                    # (32, 10)
    w2c = w2.astype(compute_dtype)                                    # (2, 32)
    b1c = b1.reshape(HID_DIM, 1).astype(jnp.float32)                  # (32, 1)
    b2c = b2.reshape(OUT_DIM, 1).astype(jnp.float32)                  # (2, 1)

    itemsize = jnp.dtype(compute_dtype).itemsize
    cost = pl.CostEstimate(
        flops=2 * B * (IN_DIM * HID_DIM + HID_DIM * OUT_DIM),
        transcendentals=2 * B * OUT_DIM,                              # sigmoid ~ exp + recip
        bytes_accessed=(B * IN_DIM * 4                                # x stays f32 in HBM
                        + (HID_DIM * IN_DIM + OUT_DIM * HID_DIM) * itemsize
                        + (HID_DIM + OUT_DIM) * 4
                        + B * OUT_DIM * 4),
    )

    out_t = pl.pallas_call(
        _mlp_kernel,
        out_shape=jax.ShapeDtypeStruct((OUT_DIM, B), jnp.float32),
        grid=grid,
        in_specs=[
            pl.BlockSpec((tb, IN_DIM), lambda i: (i, 0)),        # x marches over batch tiles
            pl.BlockSpec((HID_DIM, IN_DIM), lambda i: (0, 0)),   # weights stay VMEM-resident
            pl.BlockSpec((HID_DIM, 1), lambda i: (0, 0)),
            pl.BlockSpec((OUT_DIM, HID_DIM), lambda i: (0, 0)),
            pl.BlockSpec((OUT_DIM, 1), lambda i: (0, 0)),
        ],
        out_specs=pl.BlockSpec((OUT_DIM, tb), lambda i: (0, i)),
        compiler_params=pltpu.CompilerParams(
            dimension_semantics=("parallel",),      # megacore / dual-TC sharding on v7x
            vmem_limit_bytes=32 << 20,              # fits block_b=8192 with wide margin
        ),
        cost_estimate=cost,
    )(x, w1c, b1c, w2c, b2c)

    # Consumers that can take the (2, B) lane-dense layout should use out_t
    # directly; the transpose below is kept only to match nn.Module semantics.
    return out_t.T                                                    # (B, 2) f32


@jax.jit
def _net_forward_xla(x, w1, b1, w2, b2):
    h = jnp.maximum(x @ w1.T + b1, 0.0)
    return jax.nn.sigmoid(h @ w2.T + b2)


def net_forward(x, w1, b1, w2, b2, *, block_b=8192, compute_dtype=jnp.bfloat16,
                min_pallas_batch=1024):
    """Dispatch: tiny batches go to a fused XLA path, large batches to Pallas.

    x:  (B, 10) f32
    w1: (32, 10), b1: (32,)   -- PyTorch nn.Linear layout (out, in)
    w2: (2, 32),  b2: (2,)
    returns (B, 2) f32
    """
    if x.shape[0] < min_pallas_batch:
        return _net_forward_xla(x, w1, b1, w2, b2)
    return _net_forward_pallas(x, w1, b1, w2, b2,
                               block_b=block_b, compute_dtype=compute_dtype)


def init_params(key):
    """Deterministic params in PyTorch nn.Linear (out, in) layout."""
    k1, k2, k3, k4 = jax.random.split(key, 4)
    lim1 = 1.0 / float(IN_DIM) ** 0.5
    lim2 = 1.0 / float(HID_DIM) ** 0.5
    w1 = jax.random.uniform(k1, (HID_DIM, IN_DIM), jnp.float32, -lim1, lim1)
    b1 = jax.random.uniform(k2, (HID_DIM,), jnp.float32, -lim1, lim1)
    w2 = jax.random.uniform(k3, (OUT_DIM, HID_DIM), jnp.float32, -lim2, lim2)
    b2 = jax.random.uniform(k4, (OUT_DIM,), jnp.float32, -lim2, lim2)
    return w1, b1, w2, b2


def net_forward_ref(x, w1, b1, w2, b2):
    h = jnp.maximum(x @ w1.T + b1, 0.0)
    return jax.nn.sigmoid(h @ w2.T + b2)


if __name__ == "__main__":
    key = jax.random.PRNGKey(0)
    kx, kp = jax.random.split(key)
    w1, b1, w2, b2 = init_params(kp)

    # Small single-tile batch forced through the Pallas path (partial tile).
    B = 8
    x = jax.random.normal(kx, (B, IN_DIM), jnp.float32)
    ref = net_forward_ref(x, w1, b1, w2, b2)
    out = jax.block_until_ready(net_forward(x, w1, b1, w2, b2, min_pallas_batch=0))
    assert out.shape == (B, OUT_DIM)
    assert jnp.allclose(out, ref, atol=2e-2, rtol=2e-2), "mismatch (bf16 path, B=8)"

    # Ragged multi-step grid (3 steps, partial tail block), bf16 and f32 compute.
    B2 = 300
    x2 = jax.random.normal(jax.random.PRNGKey(1), (B2, IN_DIM), jnp.float32)
    ref2 = net_forward_ref(x2, w1, b1, w2, b2)
    out2 = jax.block_until_ready(
        net_forward(x2, w1, b1, w2, b2, block_b=128, min_pallas_batch=0))
    assert out2.shape == (B2, OUT_DIM)
    assert jnp.allclose(out2, ref2, atol=2e-2, rtol=2e-2), "mismatch (bf16 path, B=300)"
    out3 = jax.block_until_ready(
        net_forward(x2, w1, b1, w2, b2, block_b=128, compute_dtype=jnp.float32,
                    min_pallas_batch=0))
    assert jnp.allclose(out3, ref2, atol=1e-5, rtol=1e-5), "mismatch (f32 path, B=300)"

    # Default dispatch: above-threshold batch -> Pallas (default tile).
    B3 = 2048
    x3 = jax.random.normal(jax.random.PRNGKey(2), (B3, IN_DIM), jnp.float32)
    out4 = jax.block_until_ready(net_forward(x3, w1, b1, w2, b2))
    assert jnp.allclose(out4, net_forward_ref(x3, w1, b1, w2, b2),
                        atol=2e-2, rtol=2e-2), "mismatch (default dispatch, B=2048)"

    # Default dispatch: below-threshold batch -> fused XLA fallback.
    out5 = jax.block_until_ready(net_forward(x, w1, b1, w2, b2))
    assert jnp.allclose(out5, ref, atol=1e-5, rtol=1e-5), "mismatch (XLA fallback, B=8)"

    print("KERNEL_OK")
</pallas_src>

<mosaic_0001>
module attributes {stable_mosaic.version = 11 : i64} {
  func.func @_mlp_kernel(%arg0: i32, %arg1: memref<128x10xf32, #tpu.memory_space<vmem>>, %arg2: memref<32x10xbf16, #tpu.memory_space<vmem>>, %arg3: memref<32x1xf32, #tpu.memory_space<vmem>>, %arg4: memref<2x32xbf16, #tpu.memory_space<vmem>>, %arg5: memref<2x1xf32, #tpu.memory_space<vmem>>, %arg6: memref<2x128xf32, #tpu.memory_space<vmem>>) attributes {dimension_semantics = [#tpu.dimension_semantics<parallel>], iteration_bounds = array<i64: 1>, scalar_prefetch = 0 : i64, scratch_operands = 0 : i64, tpu.core_type = #tpu.core_type<tc>, window_params = [{transform_indices = @transform_0, window_bounds = array<i64: 128, 10>}, {pipeline_mode = #tpu.pipeline_mode<synchronous>, transform_indices = @transform_1, window_bounds = array<i64: 32, 10>}, {pipeline_mode = #tpu.pipeline_mode<synchronous>, transform_indices = @transform_2, window_bounds = array<i64: 32, 1>}, {pipeline_mode = #tpu.pipeline_mode<synchronous>, transform_indices = @transform_3, window_bounds = array<i64: 2, 32>}, {pipeline_mode = #tpu.pipeline_mode<synchronous>, transform_indices = @transform_4, window_bounds = array<i64: 2, 1>}, {transform_indices = @transform_5, window_bounds = array<i64: 2, 128>}]} {
    %c0 = arith.constant 0 : index
    %c0_0 = arith.constant 0 : index
    %0 = vector.load %arg1[%c0, %c0_0] : memref<128x10xf32, #tpu.memory_space<vmem>>, vector<128x10xf32>
    %1 = arith.truncf %0 : vector<128x10xf32> to vector<128x10xbf16>
    %c0_1 = arith.constant 0 : index
    %c0_2 = arith.constant 0 : index
    %2 = vector.load %arg2[%c0_1, %c0_2] : memref<32x10xbf16, #tpu.memory_space<vmem>>, vector<32x10xbf16>
    %cst = arith.constant dense<0.000000e+00> : vector<32x128xf32>
    %3 = tpu.matmul %2, %1, %cst {dimension_numbers = #tpu.dot_dimension_numbers<[1], [1], [0], [0], [0, 0, 1, 0], [], []>} : vector<32x10xbf16>, vector<128x10xbf16>, vector<32x128xf32> -> vector<32x128xf32>
    %c0_3 = arith.constant 0 : index
    %c0_4 = arith.constant 0 : index
    %4 = vector.load %arg3[%c0_3, %c0_4] : memref<32x1xf32, #tpu.memory_space<vmem>>, vector<32x1xf32>
    %5 = vector.broadcast %4 : vector<32x1xf32> to vector<32x128xf32>
    %6 = arith.addf %3, %5 : vector<32x128xf32>
    %cst_5 = arith.constant 0.000000e+00 : f32
    %7 = vector.broadcast %cst_5 : f32 to vector<32x128xf32>
    %8 = arith.maximumf %6, %7 : vector<32x128xf32>
    %c0_6 = arith.constant 0 : index
    %c0_7 = arith.constant 0 : index
    %9 = vector.load %arg4[%c0_6, %c0_7] : memref<2x32xbf16, #tpu.memory_space<vmem>>, vector<2x32xbf16>
    %10 = arith.truncf %8 : vector<32x128xf32> to vector<32x128xbf16>
    %cst_8 = arith.constant dense<0.000000e+00> : vector<2x128xf32>
    %11 = tpu.matmul %9, %10, %cst_8 {dimension_numbers = #tpu.dot_dimension_numbers<[1], [0], [0], [1], [0, 0, 1, 1], [], []>} : vector<2x32xbf16>, vector<32x128xbf16>, vector<2x128xf32> -> vector<2x128xf32>
    %c0_9 = arith.constant 0 : index
    %c0_10 = arith.constant 0 : index
    %12 = vector.load %arg5[%c0_9, %c0_10] : memref<2x1xf32, #tpu.memory_space<vmem>>, vector<2x1xf32>
    %13 = vector.broadcast %12 : vector<2x1xf32> to vector<2x128xf32>
    %14 = arith.addf %11, %13 : vector<2x128xf32>
    %15 = arith.negf %14 : vector<2x128xf32>
    %16 = math.exp %15 : vector<2x128xf32>
    %cst_11 = arith.constant 1.000000e+00 : f32
    %17 = vector.broadcast %cst_11 : f32 to vector<2x128xf32>
    %18 = arith.addf %17, %16 : vector<2x128xf32>
    %19 = arith.divf %17, %18 : vector<2x128xf32>
    %c0_12 = arith.constant 0 : index
    %c0_13 = arith.constant 0 : index
    %20 = vector.load %arg6[%c0_12, %c0_13] : memref<2x128xf32, #tpu.memory_space<vmem>>, vector<2x128xf32>
    tpu.vector_store %arg6[%c0_12, %c0_13], %19 {strides = array<i32>} : memref<2x128xf32, #tpu.memory_space<vmem>>, vector<2x128xf32>,
    return
  }
  func.func @transform_0(%arg0: i32) -> (i32, i32) {
    %c0_i32 = arith.constant 0 : i32
    %c0_i32_0 = arith.constant 0 : i32
    return %arg0, %c0_i32 : i32, i32
  }
  func.func @transform_1(%arg0: i32) -> (i32, i32) {
    %c0_i32 = arith.constant 0 : i32
    %c0_i32_0 = arith.constant 0 : i32
    %c0_i32_1 = arith.constant 0 : i32
    return %c0_i32, %c0_i32_0 : i32, i32
  }
  func.func @transform_2(%arg0: i32) -> (i32, i32) {
    %c0_i32 = arith.constant 0 : i32
    %c0_i32_0 = arith.constant 0 : i32
    %c0_i32_1 = arith.constant 0 : i32
    return %c0_i32, %c0_i32_0 : i32, i32
  }
  func.func @transform_3(%arg0: i32) -> (i32, i32) {
    %c0_i32 = arith.constant 0 : i32
    %c0_i32_0 = arith.constant 0 : i32
    %c0_i32_1 = arith.constant 0 : i32
    return %c0_i32, %c0_i32_0 : i32, i32
  }
  func.func @transform_4(%arg0: i32) -> (i32, i32) {
    %c0_i32 = arith.constant 0 : i32
    %c0_i32_0 = arith.constant 0 : i32
    %c0_i32_1 = arith.constant 0 : i32
    return %c0_i32, %c0_i32_0 : i32, i32
  }
  func.func @transform_5(%arg0: i32) -> (i32, i32) {
    %c0_i32 = arith.constant 0 : i32
    %c0_i32_0 = arith.constant 0 : i32
    return %c0_i32, %arg0 : i32, i32
  }
}

</mosaic_0001>

<bundles_post_ra>
// kernel: _net_forward_pallas.1
= control target key start
LH: loop header
LB: loop body
LE: loop exit
PB: predicated region body
PF: predicated region fallthrough
CT: control target
= control target key end

     0   :  { %vm84_vm0 = vcmask 80896   ;;  %v333_v5 = vmov 0   ;;  %s469_s0 = inlined_call_operand.vmem [shape: f32[8,10], index: 0, kind: input, shape index: {}]   ;;  %s470_s1 = inlined_call_operand.vmem [shape: bf16[32,10], index: 1, kind: input, shape index: {}]   ;;  %s471_s2 = inlined_call_operand.vmem [shape: f32[32,1], index: 2, kind: input, shape index: {}]   ;;  %s472_s3 = inlined_call_operand.vmem [shape: bf16[2,32], index: 3, kind: input, shape index: {}]   ;;  %s473_s4 = inlined_call_operand.vmem [shape: f32[2,1], index: 4, kind: input, shape index: {}]   ;;  %s474_s5 = inlined_call_operand.hbm [shape: f32[2,8], index: 5, kind: output, shape index: {}]  }
   0x1   :  { %v22_v0 = vld [vmem:[%s469_s0] sm:$0xff]  ;;  %v23_v1 = vld [vmem:[%s469_s0 + $0x8] sm:$0xff]  ;;  %v24_v2 = vld [vmem:[%s469_s0 + $0x10] sm:$0xff]  ;;  %301 = vset.pattern.permute.xlu0 %v333_v5  ;;  %302 = vset.pattern.permute.xlu1 %v333_v5 }
   0x2   :  { %v38_v3 = vpack.c.bf16 %v23_v1, %v22_v0  ;;  %v25_v4 = vld [vmem:[%s469_s0 + $0x18] sm:$0xff]  ;;  %v26_v8 = vld [vmem:[%s469_s0 + $0x20] sm:$0xff]  ;;  %v27_v9 = vld [vmem:[%s469_s0 + $0x28] sm:$0xff] }
   0x3   :  { %v39_v6 = vpack.c.bf16 %v25_v4, %v24_v2  ;;  %v303_v10 = vld [vmem:[%s470_s1] sm:$0xff]   ;;  %v52_v12 = vld [vmem:[%s471_s2 + $0x10] sm:$0xff]  ;;  %v40_v14 = vpack.c.bf16 %v27_v9, %v26_v8  ;;  %v51_v15 = vld [vmem:[%s471_s2 + $0x8] sm:$0xff] }
   0x4   :  { %289 = vmatprep.subr.msk.bf16.mxu0 %vm84_vm0, %v38_v3  ;;  %v92_v7 = vsel %vm84_vm0, %v38_v3, 0  ;;  %v50_v11 = vld [vmem:[%s471_s2] sm:$0xff]  ;;  %277 = vmatprep.mubr.msk.bf16.mxu0 %vm84_vm0, %v303_v10 }
   0x5   :  { %262 = vmatpush3.bf16.xpose.msra.mxu0 %v92_v7  ;;  %56 = vperm.xlu0 %301, %v50_v11   ;;  %v95_v13 = vsel %vm84_vm0, %v39_v6, 0 }
   0x6   :  { %290 = vmatprep.subr.msk.bf16.mxu0 %vm84_vm0, %v39_v6  ;;  %66 = vperm.xlu1 %302, %v52_v12  }
   0x7   :  { %10 = vsyncpa [#allocation3], 0  ;;  %v53_v16 = vld [vmem:[%s471_s2 + $0x18] sm:$0xff]  ;;  %v171_v17 = vld [vmem:[%s473_s4] sm:$0x3]  ;;  %v98_v20 = vsel %vm84_vm0, %v40_v14, 0 }
   0x8   :  { %v28_v18 = vld [vmem:[%s469_s0 + $0x30] sm:$0xff]  ;;  %v29_v19 = vld [vmem:[%s469_s0 + $0x38] sm:$0xff]  ;;  %v30_v22 = vld [vmem:[%s469_s0 + $0x40] sm:$0xff]  ;;  %v334_v40 = vmov 0.0   ;;  %vm335_vm1 = vmmov 0   ;;  %vm177_vm2 = vcmask 261120  }
   0x9   :  { %61 = vperm.xlu0 %301, %v51_v15   ;;  %v41_v21 = vpack.c.bf16 %v29_v19, %v28_v18  ;;  %v31_v23 = vld [vmem:[%s469_s0 + $0x48] sm:$0xff]  ;;  %v32_v26 = vld [vmem:[%s469_s0 + $0x50] sm:$0xff]  ;;  %v33_v27 = vld [vmem:[%s469_s0 + $0x58] sm:$0xff]  ;;  %281 = vmatprep.subr.bf16.mxu1 %v334_v40  ;;  %s336_s12 = smov [#allocation2]  }
   0xa   :  { %71 = vperm.xlu1 %302, %v53_v16   ;;  %v42_v25 = vpack.c.bf16 %v31_v23, %v30_v22  ;;  %v43_v29 = vpack.c.bf16 %v33_v27, %v32_v26  ;;  %v34_v30 = vld [vmem:[%s469_s0 + $0x60] sm:$0xff]  ;;  %v35_v31 = vld [vmem:[%s469_s0 + $0x68] sm:$0xff]  ;;  %v36_v34 = vld [vmem:[%s469_s0 + $0x70] sm:$0xff]  ;;  %285 = vmatprep.mubr.msk.bf16.mxu1 %vm335_vm1, %v334_v40  ;;  %s234_s13 = sshll.u32 %s336_s12, 4  ;;  %s235_s13 = int_to_ptr.vmem [resolvable:$true] %s234_s13 }
   0xb   :  { %v101_v24 = vsel %vm84_vm0, %v41_v21, 0  ;;  %v44_v33 = vpack.c.bf16 %v35_v31, %v34_v30  ;;  %v37_v35 = vld [vmem:[%s469_s0 + $0x78] sm:$0xff]  ;;  %v304_v39 = vld [vmem:[%s470_s1 + $0x8] sm:$0xff]   ;;  %v168_v59 = vld [vmem:[%s472_s3] sm:$0x1]  ;;  %s309_s14 = scalar_lea.vmem %s235_s13, 32  ;;  %p314_p1 = scmp.lt.s32.totalorder %s235_s13, %s235_s13 }
   0xc   :  { %v104_v28 = vsel %vm84_vm0, %v42_v25, 0  ;;  %v107_v32 = vsel %vm84_vm0, %v43_v29, 0  ;;  %v45_v37 = vpack.c.bf16 %v37_v35, %v36_v34  ;;  %p310_p0 = scmp.ne.s32.totalorder %s235_s13, %s309_s14  ;;  %p315_p2 = scmp.lt.s32.totalorder %s309_s14, %s309_s14 }
   0xd   :  { %264 = vmatpush3.bf16.xpose.msra.mxu0 %v95_v13  ;;  %174 = vperm.xlu0 %301, %v171_v17   ;;  %v110_v36 = vsel %vm84_vm0, %v44_v33, 0 }
   0xe   :  { %291 = vmatprep.subr.msk.bf16.mxu0 %vm84_vm0, %v40_v14  ;;  %v113_v38 = vsel %vm84_vm0, %v45_v37, 0  ;;  %p316_p3 = por %p315_p2, %p314_p1 }
  0x10   :  { %p317_p4 = pnand %p316_p3, %p310_p0 }
  0x15   :  { %266 = vmatpush3.bf16.xpose.msra.mxu0 %v98_v20 }
  0x16   :  { %292 = vmatprep.subr.msk.bf16.mxu0 %vm84_vm0, %v41_v21 }
  0x1d   :  { %268 = vmatpush3.bf16.xpose.msra.mxu0 %v101_v24 }
  0x1e   :  { %293 = vmatprep.subr.msk.bf16.mxu0 %vm84_vm0, %v42_v25 }
  0x25   :  { %270 = vmatpush3.bf16.xpose.msra.mxu0 %v104_v28 }
  0x26   :  { %294 = vmatprep.subr.msk.bf16.mxu0 %vm84_vm0, %v43_v29 }
  0x2d   :  { %272 = vmatpush3.bf16.xpose.msra.mxu0 %v107_v32 }
  0x2e   :  { %295 = vmatprep.subr.msk.bf16.mxu0 %vm84_vm0, %v44_v33 }
  0x35   :  { %274 = vmatpush3.bf16.xpose.msra.mxu0 %v110_v36 }
  0x36   :  { %296 = vmatprep.subr.msk.bf16.mxu0 %vm84_vm0, %v45_v37 }
  0x3d   :  { %276 = vmatpush3.bf16.xpose.msra.mxu0 %v113_v38 }
  0x44   :  { %278 = vmatmul.mubr.msk.bf16.vlgmr.msra.gmra.mrb[0].mxu0 %vm84_vm0, %v304_v39 }
  0x84   :  { %v57_v42 = vpop.permute.xlu0 %56 }
  0x85   :  { %v67_v41 = vpop.permute.xlu1 %66 }
  0x88   :  { %v62_v49 = vpop.permute.xlu0 %61 }
  0x89   :  { %v72_v44 = vpop.permute.xlu1 %71 }
  0x8c   :  { %v175_v60 = vpop.permute.xlu0 %174 }
 0x117   :  { %v279_v43 = vpop.f32.mrb[0].mxu0 }
 0x118   :  { %v158_v45 = vadd.f32 %v279_v43, %v67_v41  ;;  %v149_v46 = vpop.f32.mrb[1].mxu0 }
 0x119   :  { %v150_v47 = vadd.f32 %v149_v46, %v57_v42  ;;  %v280_v48 = vpop.f32.mrb[2].mxu0 }
 0x11a   :  { %v161_v50 = vadd.f32 %v280_v48, %v72_v44  ;;  %v152_v51 = vpop.f32.mrb[3].mxu0  ;;  %v166_v53 = vmax.f32 %v158_v45, 0.0 }
 0x11b   :  { %v153_v52 = vadd.f32 %v152_v51, %v62_v49  ;;  %v164_v55 = vmax.f32 %v150_v47, 0.0 }
 0x11c   :  { %v167_v54 = vmax.f32 %v161_v50, 0.0 }
 0x11d   :  { %v165_v56 = vmax.f32 %v153_v52, 0.0 }
 0x11e   :  { %v170_v57 = vpack.c.bf16 %v167_v54, %v166_v53 }
 0x11f   :  { %v169_v58 = vpack.c.bf16 %v165_v56, %v164_v55 }
 0x121   :  { %282 = vmatpush3.bf16.msra.mxu1 %v169_v58 }
 0x122   :  { %283 = vmatprep.subr.bf16.mxu1 %v334_v40 }
 0x125   :  { %284 = vmatpush3.bf16.msra.mxu1 %v170_v57 }
 0x128   :  { %286 = vmatmul.mubr.msk.bf16.vlgmr.msra.gmra.mrb[0].mxu1 %vm177_vm2, %v168_v59 }
 0x1fb   :  { %v215_v61 = vpop.f32.mrb[0].mxu1 }
 0x1fc   :  { %v216_v62 = vadd.f32 %v215_v61, %v175_v60  ;;  %v287_v63 = vpop.f32.mrb[1].mxu1 }
 0x1fd   :  { %v218_v0 = vpop.f32.mrb[2].mxu1 }
 0x1fe   :  { %v247_v1 = vmul.f32 -1.442695, %v216_v62  ;;  %v288_v2 = vpop.f32.mrb[3].mxu1 }
 0x200   :  { %305 = vpow2.f32 %v247_v1 }
 0x20a   :  { %v306_v3 = vpop.eup %305 }
 0x20b   :  { %v224_v4 = vadd.f32 1.0, %v306_v3 }
 0x20d   :  { %307 = vrcp.f32 %v224_v4 }
 0x217   :  { %v308_v5 = vpop.eup %307 }
 0x218   :  { %227 = vst [vmem:[#allocation2] sm:$0x3] %v308_v5 }
 0x219   :  { %320 = shalt.err (!%p317_p4)
}
 0x21a   :  { %s321_s16 = scalar_lea.hbm %s474_s5, 32 }
 0x21b   :  { %p322_p5 = scmp.ne.s32.totalorder %s474_s5, %s321_s16  ;;  %p325_p6 = scmp.lt.u32.totalorder %s321_s16, %s474_s5 }
 0x21d   :  { %p327_p7 = pnand %p325_p6, %p322_p5 }
 0x21f   :  { %330 = shalt.err (!%p327_p7)
}
 0x220   :  { %237 = dma.vmem_to_hbm [thread:$0]  %s235_s13, 32, %s474_s5, [#allocation3]  }
 0x221   :  { %331 = dma.done.wait [#allocation3], 32  }
 0x222   :  { %332 = vsyncadd [#allocation3], 4294967264 }
 0x223   :  { %241 = vsyncpa [#allocation3], 1 }

</bundles_post_ra>
